<compile_context>
chip_gen: v6e
topology: v6e:2x2x1
jax: 0.10.0
libtpu: 0.0.40
codegen_flags: <defaults>
</compile_context>

<pallas_src>
import jax
import jax.numpy as jnp
from jax import lax
from jax.experimental import pallas as pl
from jax.experimental.pallas import tpu as pltpu


def _round_up(x, m):
    return ((x + m - 1) // m) * m


def _conv_matmul_kernel(wgen_ref, p_ref, out_ref):
    # wgen_ref: (1, C_out_pad, F_pad)   per-sample generated conv weight (im2col layout)
    # p_ref   : (1, F_pad, HW_TILE)     transposed im2col patches (lane-dense HW)
    # out_ref : (1, C_out_pad, HW_TILE)
    # conv2d as an im2col matmul on the MXU, output lane-dense over HW.
    out = lax.dot_general(wgen_ref[0], p_ref[0],
                          (((1,), (0,)), ((), ())),
                          preferred_element_type=jnp.float32)
    out_ref[0] = out.astype(out_ref.dtype)


def _im2col_T(x, k, stride, padding):
    # x: [B, C, H, W] (NCHW) -> patches [B, C*K*K, Ho*Wo], feature order (c, kh, kw).
    b, c, h, w = x.shape
    xp = jnp.pad(x, ((0, 0), (0, 0), (padding, padding), (padding, padding)))
    ho = (h + 2 * padding - k) // stride + 1
    wo = (w + 2 * padding - k) // stride + 1
    cols = []
    for kh in range(k):
        for kw in range(k):
            cols.append(xp[:, :,
                           kh:kh + (ho - 1) * stride + 1:stride,
                           kw:kw + (wo - 1) * stride + 1:stride])       # [B, C, Ho, Wo]
    p = jnp.stack(cols, axis=2)                                         # [B, C, K*K, Ho, Wo]
    return p.reshape(b, c * k * k, ho * wo), ho, wo


def _pick_hw_tiling(hw, f_pad, c_out_pad, stream_budget_bytes, patch_elem_bytes):
    """Choose (hw_tile, hw_pad, n_hw) so double-buffered streaming tiles fit the budget
    and padding waste is < n_hw*128 columns (not a full tile)."""
    hw128 = _round_up(max(hw, 1), 128)
    # Per HW column (double-buffered): patches tile + f32 output tile.
    bytes_per_col = 2 * (f_pad * patch_elem_bytes + c_out_pad * 4)
    max_cols = max(128, (stream_budget_bytes // bytes_per_col) // 128 * 128)
    if hw128 <= max_cols:
        return hw128, hw128, 1
    n_hw = -(-hw128 // max_cols)                       # cdiv
    hw_tile = _round_up(-(-hw128 // n_hw), 128)        # smallest 128-aligned even split
    return hw_tile, hw_tile * n_hw, n_hw


def dynamic_conv2d(x, w1, b1, w2, b2, *, out_channels, kernel_size, stride=1,
                   padding=0, patches_dtype=jnp.float32,
                   stream_vmem_budget_bytes=36 * 1024 * 1024,
                   vmem_limit_bytes=48 * 1024 * 1024):
    """x: [B, C_in, H, W] (NCHW). w1:[C_in,128] b1:[1,128] w2:[128,C_out*C_in*K*K]
    b2:[1,C_out*C_in*K*K].  Returns [B, C_out, Ho, Wo]."""
    b, c_in, h, w = x.shape
    k = kernel_size
    feat = c_in * k * k

    x = x.astype(jnp.float32)

    # ---- Per-sample weight generation, hoisted out of the streaming kernel --------
    # means -> Linear(C_in,128) -> ReLU -> Linear(128, C_out*F), batched over samples.
    # Tiny (B x 128 x C_out*F flops); the conv kernel only ever sees the generated
    # per-sample weight, never W2 itself.
    means = jnp.mean(x, axis=(2, 3))                                     # [B, C_in]
    hid = jnp.maximum(means @ w1.astype(jnp.float32)
                      + b1.astype(jnp.float32), 0.0)                     # [B, 128]
    wflat = hid @ w2.astype(jnp.float32) + b2.astype(jnp.float32)        # [B, C_out*F]
    wgen = wflat.reshape(b, out_channels, feat)                          # [B, C_out, F]

    # ---- Transposed im2col [B, F, HW]; pad F to sublane multiple ------------------
    patches, ho, wo = _im2col_T(x, k, stride, padding)
    hw = ho * wo

    f_pad = _round_up(feat, 8)
    c_out_pad = _round_up(out_channels, 8)
    patch_elem_bytes = jnp.dtype(patches_dtype).itemsize
    hw_tile, hw_pad, n_hw = _pick_hw_tiling(hw, f_pad, c_out_pad,
                                            stream_vmem_budget_bytes, patch_elem_bytes)

    patches = jnp.pad(patches, ((0, 0), (0, f_pad - feat), (0, hw_pad - hw)))
    patches = patches.astype(patches_dtype)
    wgen = jnp.pad(wgen, ((0, 0), (0, c_out_pad - out_channels), (0, f_pad - feat)))
    wgen = wgen.astype(patches_dtype)

    out = pl.pallas_call(
        _conv_matmul_kernel,
        out_shape=jax.ShapeDtypeStruct((b, c_out_pad, hw_pad), jnp.float32),
        grid_spec=pltpu.PrefetchScalarGridSpec(
            num_scalar_prefetch=0,
            grid=(b, n_hw),
            in_specs=[
                pl.BlockSpec((1, c_out_pad, f_pad), lambda i, j: (i, 0, 0)),   # wgen
                pl.BlockSpec((1, f_pad, hw_tile), lambda i, j: (i, 0, j)),     # patches^T
            ],
            out_specs=pl.BlockSpec((1, c_out_pad, hw_tile), lambda i, j: (i, 0, j)),
        ),
        compiler_params=pltpu.CompilerParams(
            dimension_semantics=("parallel", "parallel"),
            vmem_limit_bytes=vmem_limit_bytes),
    )(wgen, patches)

    # Lane-dense output reshapes straight to NCHW (no transpose pass).
    return out[:, :out_channels, :hw].reshape(b, out_channels, ho, wo)


def reference_forward(x, w1, b1, w2, b2, *, out_channels, kernel_size, stride, padding):
    """Pure-JAX reference mirroring the PyTorch forward exactly."""
    b, c_in, _, _ = x.shape
    k = kernel_size
    outs = []
    for i in range(b):
        m = x[i].reshape(c_in, -1).mean(axis=1)                          # [C_in]
        hid = jnp.maximum(m @ w1 + b1[0], 0.0)                           # [128]
        wf = hid @ w2 + b2[0]                                            # [C_out*C_in*K*K]
        wgt = wf.reshape(out_channels, c_in, k, k)                       # OIHW
        o = lax.conv_general_dilated(
            x[i:i + 1], wgt, (stride, stride),
            [(padding, padding), (padding, padding)],
            dimension_numbers=("NCHW", "OIHW", "NCHW"))
        outs.append(o)
    return jnp.concatenate(outs, axis=0)


if __name__ == "__main__":
    # Small shapes consistent with the module.
    B, C_IN, C_OUT, K, H, W = 2, 4, 8, 3, 16, 16
    STRIDE, PAD = 1, 1

    key = jax.random.PRNGKey(0)
    kx, k1, kb1, k2, kb2 = jax.random.split(key, 5)

    x = jax.random.normal(kx, (B, C_IN, H, W), dtype=jnp.float32)

    # Deterministic weight-generator MLP parameters.
    # (Stored as [in, out] so y = x @ W + b, matching torch's x @ W.T + b.)
    w1 = jax.random.normal(k1, (C_IN, 128), dtype=jnp.float32) * 0.1
    b1 = jax.random.normal(kb1, (1, 128), dtype=jnp.float32) * 0.1
    w2 = jax.random.normal(k2, (128, C_OUT * C_IN * K * K), dtype=jnp.float32) * 0.05
    b2 = jax.random.normal(kb2, (1, C_OUT * C_IN * K * K), dtype=jnp.float32) * 0.05

    out = dynamic_conv2d(x, w1, b1, w2, b2,
                         out_channels=C_OUT, kernel_size=K, stride=STRIDE, padding=PAD)
    out = jax.block_until_ready(out)

    ref = reference_forward(x, w1, b1, w2, b2,
                            out_channels=C_OUT, kernel_size=K, stride=STRIDE, padding=PAD)
    ref = jax.block_until_ready(ref)

    assert out.shape == (B, C_OUT, H, W), out.shape
    max_err = float(jnp.max(jnp.abs(out - ref)))
    assert max_err < 2e-3, f"mismatch vs reference, max_err={max_err}"
    print("KERNEL_OK")
</pallas_src>

<mosaic_0001>
module attributes {stable_mosaic.version = 11 : i64} {
  func.func @_conv_matmul_kernel(%arg0: i32, %arg1: i32, %arg2: memref<1x8x40xf32, #tpu.memory_space<vmem>>, %arg3: memref<1x40x256xf32, #tpu.memory_space<vmem>>, %arg4: memref<1x8x256xf32, #tpu.memory_space<vmem>>) attributes {dimension_semantics = [#tpu.dimension_semantics<parallel>, #tpu.dimension_semantics<parallel>], iteration_bounds = array<i64: 2, 1>, scalar_prefetch = 0 : i64, scratch_operands = 0 : i64, tpu.core_type = #tpu.core_type<tc>, window_params = [{transform_indices = @transform_0, window_bounds = array<i64: 1, 8, 40>}, {transform_indices = @transform_1, window_bounds = array<i64: 1, 40, 256>}, {transform_indices = @transform_2, window_bounds = array<i64: 1, 8, 256>}]} {
    %c0 = arith.constant 0 : index
    %c0_0 = arith.constant 0 : index
    %c0_1 = arith.constant 0 : index
    %0 = vector.load %arg2[%c0, %c0_0, %c0_1] : memref<1x8x40xf32, #tpu.memory_space<vmem>>, vector<1x8x40xf32>
    %1 = vector.shape_cast %0 : vector<1x8x40xf32> to vector<8x40xf32>
    %c0_2 = arith.constant 0 : index
    %c0_3 = arith.constant 0 : index
    %c0_4 = arith.constant 0 : index
    %2 = vector.load %arg3[%c0_2, %c0_3, %c0_4] : memref<1x40x256xf32, #tpu.memory_space<vmem>>, vector<1x40x256xf32>
    %3 = vector.shape_cast %2 : vector<1x40x256xf32> to vector<40x256xf32>
    %cst = arith.constant dense<0.000000e+00> : vector<8x256xf32>
    %4 = tpu.matmul %1, %3, %cst {dimension_numbers = #tpu.dot_dimension_numbers<[1], [0], [0], [1], [0, 0, 1, 1], [], []>} : vector<8x40xf32>, vector<40x256xf32>, vector<8x256xf32> -> vector<8x256xf32>
    %c0_5 = arith.constant 0 : index
    %c0_6 = arith.constant 0 : index
    %c0_7 = arith.constant 0 : index
    %5 = vector.load %arg4[%c0_5, %c0_6, %c0_7] : memref<1x8x256xf32, #tpu.memory_space<vmem>>, vector<1x8x256xf32>
    %6 = vector.shape_cast %5 : vector<1x8x256xf32> to vector<8x256xf32>
    %7 = vector.shape_cast %4 : vector<8x256xf32> to vector<1x8x256xf32>
    tpu.vector_store %arg4[%c0_5, %c0_6, %c0_7], %7 {strides = array<i32>} : memref<1x8x256xf32, #tpu.memory_space<vmem>>, vector<1x8x256xf32>,
    return
  }
  func.func @transform_0(%arg0: i32, %arg1: i32) -> (i32, i32, i32) {
    %c0_i32 = arith.constant 0 : i32
    %c0_i32_0 = arith.constant 0 : i32
    %c0_i32_1 = arith.constant 0 : i32
    return %arg0, %c0_i32, %c0_i32_0 : i32, i32, i32
  }
  func.func @transform_1(%arg0: i32, %arg1: i32) -> (i32, i32, i32) {
    %c0_i32 = arith.constant 0 : i32
    %c0_i32_0 = arith.constant 0 : i32
    return %arg0, %c0_i32, %arg1 : i32, i32, i32
  }
  func.func @transform_2(%arg0: i32, %arg1: i32) -> (i32, i32, i32) {
    %c0_i32 = arith.constant 0 : i32
    %c0_i32_0 = arith.constant 0 : i32
    return %arg0, %c0_i32, %arg1 : i32, i32, i32
  }
}

</mosaic_0001>

<bundles_post_ra>
// kernel: tpu_custom_call.1
= control target key start
LH: loop header
LB: loop body
LE: loop exit
PB: predicated region body
PF: predicated region fallthrough
CT: control target
= control target key end

     0   :  { %7 = vsyncpa [#allocation3], 0  ;;  %s855_s0 = inlined_call_operand.hbm [shape: f32[2,8,40], index: 0, kind: input, shape index: {}]   ;;  %s856_s1 = inlined_call_operand.hbm [shape: f32[2,40,256], index: 1, kind: input, shape index: {}]   ;;  %s857_s2 = inlined_call_operand.hbm [shape: f32[2,8,256], index: 2, kind: output, shape index: {}]  }
   0x1   :  { %9 = vsyncpa [#allocation3 + $0x1], 0 }
   0x2   :  { %10 = vsyncpa [#allocation6], 0 }
   0x3   :  { %12 = vsyncpa [#allocation6 + $0x1], 0 }
   0x4   :  { %13 = vsyncpa [#allocation4], 0 }
   0x5   :  { %15 = vsyncpa [#allocation4 + $0x1], 0  ;;  %s684_s9 = smov 0   ;;  %s686_s10 = smov 0  }
   0x6   :  { %s688_s11 = smov 0   ;;  %s690_s12 = smov 0  }
   0x7   :  { %s692_s13 = smov 0   ;;  %s694_s14 = smov 0  }
   0x8 LB: > { %s431_s15 = sadd.s32 4294967295, %s661_s14   ;;  %s432_s16 = sadd.s32 4294967294, %s661_s14   ;;  %s661_s14 = sphi %s694_s14, %s21_s14   ;;  %s657_s13 = sphi %s692_s13, %s869_s13   ;;  %s653_s12 = sphi %s690_s12, %s868_s12   ;;  %s649_s11 = sphi %s688_s11, %s867_s11   ;;  %s645_s10 = sphi %s686_s10, %s866_s10   ;;  %s641_s9 = sphi %s684_s9, %s865_s9  }
   0x9   : > { %s33_s17 = sadd.s32 1, %s657_s13  ;;  %s40_s18 = sadd.s32 1, %s649_s11 }
   0xa   : > { %p35_p0 = scmp.ge.s32.totalorder %s33_s17, 2  ;;  %p47_p1 = scmp.ne.s32.totalorder %s649_s11, %s645_s10 }
   0xb   : > { %p48_p2 = scmp.eq.s32.totalorder %s661_s14, 0  ;;  %p53_p3 = scmp.ne.s32.totalorder %s645_s10, %s641_s9 }
   0xc   : > { %s871_s17 = smov (%p35_p0, %s33_s17), 0  ;;  %p54_p5 = scmp.eq.s32.totalorder %s431_s15, 0 }
   0xd   : > { %p725_p4 = por %p48_p2, %p47_p1  ;;  %s37_s20 = ssub.s32 %s657_s13, %s871_s17 }
   0xe   : > { %p107_p6 = scmp.eq.s32.totalorder %s431_s15, 1  ;;  %p38_p7 = scmp.eq.s32.totalorder %s37_s20, 0 }
   0xf   : > { %p731_p8 = por %p54_p5, %p53_p3  ;;  %p113_p10 = scmp.eq.s32.totalorder %s432_s16, 1 }
  0x10   : > { %p735_p9 = por %p107_p6, %p47_p1  ;;  %p468_p13 = scmp.lt.s32.totalorder %s661_s14, 2 }
  0x11   : > { %s740_s23 = scalar_select %p38_p7, %s649_s11, %s40_s18  }
  0x12   : > { %p742_p11 = por %p113_p10, %p53_p3  ;;  %s749_s25 = sand.u32 1, %s649_s11  }
  0x13   : > { %s435_s26 = sshll.u32 %s749_s25, 3  ;;  %s436_s27 = sshll.u32 %s657_s13, 7 }
  0x14   : > { %s142_s30 = scalar_lea.hbm %s855_s0, %s436_s27  ;;  %s137_s3 = scalar_lea.vmem [#allocation2], %s435_s26 }
  0x15   : > { %s144_s4 = sshll.u32 %s137_s3, 4  ;;  %p758_p0 = pnand %p468_p13, %p725_p4  ;;  %s145_s4 = int_to_ptr.vmem [resolvable:$true] %s144_s4 }
  0x16   : > { %p438_p1 = scmp.ge.s32.totalorder %s661_s14, 1  ;;  %p172_p2 = scmp.lt.s32.totalorder %s661_s14, 3 }
  0x17   : > { %s134_s6 = scalar_lea.sflag [#allocation3], %s749_s25  ;;  %p523_p3 = pneg %p758_p0 }
  0x18   : > { %s534_s7 = scalar_lea.vmem %s145_s4, 128  ;;  %s663_s8 = smov [#allocation2]  }
  0x19   : > { %p535_p5 = scmp.ne.s32.totalorder %s145_s4, %s534_s7  ;;  %s539_s15 = sshll.u32 %s663_s8, 4  ;;  %s540_s15 = int_to_ptr.vmem [resolvable:$false] %s539_s15 }
  0x1a   : > { %s541_s16 = scalar_lea.vmem %s540_s15, 256  ;;  %p542_p4 = scmp.lt.s32.totalorder %s145_s4, %s540_s15 }
  0x1b   : > { %p537_p6 = pnand %p535_p5, %p523_p3  ;;  %p543_p10 = scmp.lt.s32.totalorder %s541_s16, %s534_s7 }
  0x1d   : > { %p538_p7 = pneg %p537_p6  ;;  %p544_p13 = por %p543_p10, %p542_p4 }
  0x1f   : > { %p545_p12 = pnand %p544_p13, %p538_p7 }
  0x21   : > { %548 = shalt.err (!%p545_p12)
}
  0x22   : > { %460 = dma.hbm_to_vmem [thread:$0]  (!%p758_p0), %s142_s30, 128, %s145_s4, %s134_s6  }
  0x23   : > { %p776_p5 = pnand %p438_p1, %p172_p2  ;;  %s448_s19 = smul.u32 80, %s749_s25 }
  0x24   : > { %s449_s20 = smul.u32 1280, %s657_s13  ;;  %s152_s7 = scalar_lea.sflag [#allocation6], %s749_s25 }
  0x25   : > { %s155_s29 = scalar_lea.vmem [#allocation5], %s448_s19  ;;  %s664_s30 = smov [#allocation5]  }
  0x26   : > { %s163_s28 = scalar_lea.hbm %s856_s1, %s449_s20  ;;  %s164_s3 = sshll.u32 %s155_s29, 4  ;;  %s165_s3 = int_to_ptr.vmem [resolvable:$true] %s164_s3 }
  0x27   : > { %s562_s8 = scalar_lea.vmem %s165_s3, 1280  ;;  %s567_s4 = sshll.u32 %s664_s30, 4  ;;  %s568_s4 = int_to_ptr.vmem [resolvable:$false] %s567_s4 }
  0x28   : > { %p563_p12 = scmp.ne.s32.totalorder %s165_s3, %s562_s8  ;;  %s569_s6 = scalar_lea.vmem %s568_s4, 2560 }
  0x29   : > { %p570_p1 = scmp.lt.s32.totalorder %s165_s3, %s568_s4  ;;  %p571_p2 = scmp.lt.s32.totalorder %s569_s6, %s562_s8 }
  0x2a   : > { %p565_p6 = pnand %p563_p12, %p523_p3 }
  0x2b   : > { %p572_p4 = por %p571_p2, %p570_p1 }
  0x2c   : > { %p566_p7 = pneg %p565_p6 }
  0x2e   : > { %p573_p10 = pnand %p572_p4, %p566_p7 }
  0x30   : > { %576 = shalt.err (!%p573_p10)
}
  0x31   : > { %s665_s15 = smov 256   ;;  %s666_s16 = smov 16  }
  0x32   : > { %463 = dma.hbm_to_vmem [thread:$0]  (!%p758_p0), %s163_s28, 1280, %s165_s3, %s152_s7, %s665_s15, %s665_s15, %s666_s16  }
  0x33   : > { %176 = sbr.rel (%p776_p5) target bundleno = 280 (0x118), region = 28  ;;  %s794_s25 = sand.u32 (!%p776_p5), 1, %s645_s10  }
  0x34   : > { %s439_s19 = sshll.u32 (!%p776_p5), %s794_s25, 3  ;;  %s179_s20 = scalar_lea.sflag (!%p776_p5), [#allocation3], %s794_s25 }
  0x35   : > { %s182_s26 = scalar_lea.vmem (!%p776_p5), [#allocation2], %s439_s19 }
  0x38   : > { %628 = dma.done.wait (%p731_p8), %s179_s20, 128  }
  0x39   : > { %630 = vsyncadd (%p731_p8), %s179_s20, 4294967168  ;;  %s450_s5 = smul.u32 80, %s794_s25  ;;  %s188_s18 = scalar_lea.sflag [#allocation6], %s794_s25 }
  0x3b   : > { %s191_s27 = scalar_lea.vmem [#allocation5], %s450_s5 }
  0x3c   : > { %632 = dma.done.wait (%p731_p8), %s188_s18, 1280  }
  0x3d   : > { %634 = vsyncadd (%p731_p8), %s188_s18, 4294966016  ;;  %v667_v0 = vmov 0.0   ;;  %v229_v1 = vld [vmem:[%s191_s27 + $0x48] sm:$0xff]  ;;  %v228_v2 = vld [vmem:[%s191_s27 + $0x40] sm:$0xff]  ;;  %vm230_vm0 = vcmask 326656   ;;  %s440_s21 = sshll.u32 %s794_s25, 4 }
  0x3e   : > { %298 = vmatprep.mubr.f32.mxu0 %v667_v0  ;;  %v227_v3 = vld [vmem:[%s191_s27 + $0x38] sm:$0xff]  ;;  %256 = vmatprep.subr.mxu0 %v229_v1  ;;  %v226_v4 = vld [vmem:[%s191_s27 + $0x30] sm:$0xff]  ;;  %v225_v5 = vld [vmem:[%s191_s27 + $0x28] sm:$0xff]  ;;  %s216_s28 = scalar_lea.vmem [#allocation7], %s440_s21  ;;  %s447_s3 = sshll.u32 %s653_s12, 8 }
  0x3f   : > { %257 = vmatpush1.msra.mxu0 %v228_v2  ;;  %v224_v6 = vld [vmem:[%s191_s27 + $0x20] sm:$0xff]  ;;  %v223_v7 = vld [vmem:[%s191_s27 + $0x18] sm:$0xff]  ;;  %v222_v8 = vld [vmem:[%s191_s27 + $0x10] sm:$0xff]  ;;  %s324_s29 = sshll.u32 %s216_s28, 4  ;;  %s322_s30 = scalar_lea.hbm %s857_s2, %s447_s3  ;;  %s810_s29 = int_to_ptr.vmem [resolvable:$true] %s324_s29 }
  0x40   : > { %258 = vmatprep.subr.mxu0 %v227_v3  ;;  %v221_v9 = vld [vmem:[%s191_s27 + $0x8] sm:$0xff]  ;;  %v220_v10 = vld [vmem:[%s191_s27] sm:$0xff]  ;;  %s308_s4 = scalar_lea.sflag [#allocation4], %s794_s25  ;;  %s577_s6 = scalar_lea.vmem %s810_s29, 256 }
  0x41   : > { %259 = vmatpush1.msra.mxu0 %v226_v4  ;;  %v219_v11 = vld [vmem:[%s182_s26] sm:$0xff]  ;;  %p578_p8 = scmp.ne.s32.totalorder %s810_s29, %s577_s6  ;;  %s668_s12 = smov [#allocation7]  }
  0x42   : > { %260 = vmatprep.subr.mxu0 %v225_v5  ;;  %s581_s15 = sshll.u32 %s668_s12, 4  ;;  %s582_s15 = int_to_ptr.vmem [resolvable:$false] %s581_s15 }
  0x43   : > { %261 = vmatpush1.msra.mxu0 %v224_v6  ;;  %p579_p0 = pnand %p578_p8, %p735_p9  ;;  %s583_s16 = scalar_lea.vmem %s582_s15, 512 }
  0x44   : > { %262 = vmatprep.subr.mxu0 %v223_v7  ;;  %p584_p13 = scmp.lt.s32.totalorder %s810_s29, %s582_s15  ;;  %p585_p5 = scmp.lt.s32.totalorder %s583_s16, %s577_s6 }
  0x45   : > { %263 = vmatpush1.msra.mxu0 %v222_v8  ;;  %p580_p3 = pneg %p579_p0 }
  0x46   : > { %264 = vmatprep.subr.mxu0 %v221_v9  ;;  %p586_p12 = por %p585_p5, %p584_p13 }
  0x47   : > { %265 = vmatpush1.msra.mxu0 %v220_v10 }
  0x48   : > { %441 = vmatmul.mubr.msk.f32.vlgmr.msra.gmra.mxu0 %vm230_vm0, %v219_v11  ;;  %p587_p6 = pnand %p586_p12, %p580_p3 }
 0x108   : > { %v300_v12 = vpop.f32.mrf.mxu0 }
 0x109   : > { %305 = vst [vmem:[%s216_s28] sm:$0xff] %v300_v12 }
 0x10a   : > { %v302_v13 = vpop.f32.mrf.mxu0 }
 0x10b   : > { %306 = vst [vmem:[%s216_s28 + $0x8] sm:$0xff] %v302_v13 }
 0x10c   : > { %590 = shalt.err (!%p587_p6)
}
 0x10d   : > { %s591_s19 = scalar_lea.hbm %s322_s30, 256  ;;  %s595_s26 = scalar_lea.hbm %s857_s2, 512 }
 0x10e   : > { %p592_p7 = scmp.ne.s32.totalorder %s322_s30, %s591_s19  ;;  %p596_p4 = scmp.lt.s32.totalorder %s322_s30, %s857_s2 }
 0x10f   : > { %p597_p10 = scmp.lt.s32.totalorder %s595_s26, %s591_s19 }
 0x110   : > { %p593_p1 = pnand %p592_p7, %p735_p9 }
 0x111   : > { %p598_p8 = por %p597_p10, %p596_p4 }
 0x112   : > { %p594_p2 = pneg %p593_p1 }
 0x114   : > { %p599_p0 = pnand %p598_p8, %p594_p2 }
 0x116   : > { %602 = shalt.err (!%p599_p0)
}
 0x117   : > { %455 = dma.vmem_to_hbm [thread:$0]  (%p735_p9), %s810_s29, 256, %s322_s30, %s308_s4  }
 0x118 PF: > { %s336_s27 = sand.u32 1, %s641_s9   ;;  %p864_p3 = scmp.ge.s32.totalorder %s661_s14, 2 }
 0x119   : > { %s337_s21 = scalar_lea.sflag [#allocation4], %s336_s27 }
 0x11a   : > { %p465_p13 = pnand %p864_p3, %p742_p11 }
 0x11c   : > { %p466_p5 = pneg %p465_p13 }
 0x11e   : > { %636 = dma.done.wait (%p466_p5), %s337_s21, 256  }
 0x11f   : > { %638 = vsyncadd (%p466_p5), %s337_s21, 4294967040  ;;  %s21_s14 = sadd.s32 1, %s661_s14   ;;  %s865_s9 = smov %s645_s10 }
 0x120   : > { %p18_p12 = scmp.ge.s32.totalorder %s21_s14, 4   ;;  %s866_s10 = smov %s649_s11 }
 0x121   : > { %s867_s11 = smov %s740_s23  ;;  %s868_s12 = smov %s657_s13 }
 0x122   : > { %s869_s13 = smov %s871_s17  ;;  %20 = sbr.rel (!%p18_p12) target bundleno = 8 (0x8), region = 86 }
 0x127   :  { %342 = vsyncpa [#allocation3], 1 }
 0x128   :  { %344 = vsyncpa [#allocation3 + $0x1], 1 }
 0x129   :  { %345 = vsyncpa [#allocation6], 1 }
 0x12a   :  { %347 = vsyncpa [#allocation6 + $0x1], 1 }
 0x12b   :  { %348 = vsyncpa [#allocation4], 1 }
 0x12c   :  { %350 = vsyncpa [#allocation4 + $0x1], 1 }

</bundles_post_ra>
